<compile_context>
chip_gen: v5e
topology: v5e:2x2
jax: 0.10.0
libtpu: 0.0.40
codegen_flags: <defaults>
</compile_context>

<pallas_src>
import jax
import jax.numpy as jnp
from jax import lax
from jax.experimental import pallas as pl
from jax.experimental.pallas import tpu as pltpu

_LN_EPS = 1e-5  # matches torch.nn.LayerNorm default


def _ln_kernel(x_ref, g_ref, b_ref, o_ref):
    """Fused flatten(2).transpose(1,2) + LayerNorm(embed_dim) on one L-tile.

    x_ref: (C, TILE_L)  channels on sublanes, tokens on lanes (lane-dense).
    g_ref, b_ref: (C, 1) float32 affine params (pre-cast in the wrapper).
    o_ref: either (TILE_L*C/128, 128)  lane-dense packed output rows, or
           (TILE_L, C)                 row-major fallback layout.
    """
    x = x_ref[...].astype(jnp.float32)                 # (C, TL)
    inv_c = 1.0 / x.shape[0]
    # One-pass mean/var over the channel (sublane) axis; all VPU work runs at
    # full TILE_L-lane utilization.
    s1 = jnp.sum(x, axis=0, keepdims=True)             # (1, TL)
    s2 = jnp.sum(x * x, axis=0, keepdims=True)         # (1, TL)
    mean = s1 * inv_c
    # Clamp: E[x^2] - E[x]^2 can go slightly negative from cancellation.
    var = jnp.maximum(s2 * inv_c - mean * mean, 0.0)
    y = (x - mean) * lax.rsqrt(var + _LN_EPS)          # EUP rsqrt
    y = y * g_ref[...] + b_ref[...]                    # (C,1) lane-broadcast
    # Cast to output dtype BEFORE the XLU transpose: packed bf16 vregs halve
    # the transpose and store traffic; LN math above stayed in f32.
    yt = jnp.transpose(y.astype(o_ref.dtype), (1, 0))  # (TL, C) token-major
    if o_ref.shape != yt.shape:
        # Lane-dense repack: (TL, C) row-major == (TL*C/128, 128) row-major.
        yt = yt.reshape(o_ref.shape)
    o_ref[...] = yt


def _num_tensorcores():
    """Best-effort TensorCore count of the local device (v7x has 2)."""
    try:
        return max(1, int(getattr(jax.devices()[0], "num_cores", 1) or 1))
    except Exception:  # pragma: no cover - defensive
        return 1


def _pick_tile_l(B, C, L, in_bytes, out_bytes, *, vmem_budget=8 * 1024 * 1024,
                 n_cores=None):
    """Largest lane-aligned L-tile that divides L and fits the VMEM budget.

    Budget is dtype-aware: double-buffered input + output tiles plus ~3 f32
    temporaries live in the kernel body.  Keep the budget <= ~8 MiB so the
    default scoped-VMEM limit is fine even on v5e (16 MiB); if raised, also
    set pltpu.CompilerParams(vmem_limit_bytes=...).
    """
    if n_cores is None:
        n_cores = _num_tensorcores()
    per_token = C * (2 * (in_bytes + out_bytes) + 3 * 4)
    cap = max(128, vmem_budget // per_token)
    cands = [t for t in (2048, 1024, 512, 256, 128) if t <= cap and L % t == 0]
    if not cands:
        cands = [128]
    if n_cores > 1:
        # Only multi-TC chips (v7x) need >= n_cores grid steps to shard the
        # "parallel" grid; on single-TC chips just take the largest tile.
        for t in cands:
            if B * (L // t) >= n_cores:
                return t
    return cands[0]


def patch_embed_forward(x_nchw, gamma=None, beta=None, *, tile_l=None):
    """PatchEmbed.forward.

    x_nchw: (B, C, H, W). Returns (B, H*W, C).
    gamma/beta None -> norm_layer=None path (pure flatten/transpose).
    """
    B, C, H, W = x_nchw.shape
    L = H * W
    x_bcl = x_nchw.reshape(B, C, L)            # free view, no data movement
    if gamma is None:
        return jnp.transpose(x_bcl, (0, 2, 1))

    # Pad L to a multiple of 128 so tiles are always lane-aligned and small
    # (never a full-L block that could exceed v7x's 64 MiB VMEM).  Padded
    # tokens are normalized garbage and sliced off below.
    Lp = ((L + 127) // 128) * 128
    if Lp != L:
        x_bcl = jnp.pad(x_bcl, ((0, 0), (0, 0), (0, Lp - L)))

    itm = jnp.dtype(x_nchw.dtype).itemsize
    if tile_l is None:
        tile_l = _pick_tile_l(B, C, Lp, itm, itm)
    assert Lp % tile_l == 0 and tile_l % 128 == 0

    g2 = gamma.reshape(C, 1).astype(jnp.float32)
    b2 = beta.reshape(C, 1).astype(jnp.float32)

    in_specs = [
        # (B, C, L) consumed with L on lanes -> lane-dense loads (fuses the
        # flatten/transpose into the kernel; no standalone XLA transpose).
        pl.BlockSpec((None, C, tile_l), lambda bi, li: (bi, 0, li)),
        pl.BlockSpec((C, 1), lambda bi, li: (0, 0)),
        pl.BlockSpec((C, 1), lambda bi, li: (0, 0)),
    ]
    grid = (B, Lp // tile_l)
    cparams = pltpu.CompilerParams(
        dimension_semantics=("parallel", "parallel"))

    def run_packed():
        # Lane-dense output: (B, Lp*C) flat bytes viewed as (B, Lp*C/128, 128).
        rows = (tile_l * C) // 128
        out = pl.pallas_call(
            _ln_kernel,
            out_shape=jax.ShapeDtypeStruct((B, (Lp * C) // 128, 128),
                                           x_nchw.dtype),
            grid_spec=pltpu.PrefetchScalarGridSpec(
                num_scalar_prefetch=0,
                grid=grid,
                in_specs=in_specs,
                out_specs=pl.BlockSpec((None, rows, 128),
                                       lambda bi, li: (bi, li, 0)),
            ),
            compiler_params=cparams,
        )(x_bcl, g2, b2)
        # Free reshape: identical row-major bytes.
        return out.reshape(B, Lp, C)

    def run_rowmajor():
        # Known-good fallback: token-major (tile_l, C) blocks (masked stores
        # when C < 128, but always lowers).
        out = pl.pallas_call(
            _ln_kernel,
            out_shape=jax.ShapeDtypeStruct((B, Lp, C), x_nchw.dtype),
            grid_spec=pltpu.PrefetchScalarGridSpec(
                num_scalar_prefetch=0,
                grid=grid,
                in_specs=in_specs,
                out_specs=pl.BlockSpec((None, tile_l, C),
                                       lambda bi, li: (bi, li, 0)),
            ),
            compiler_params=cparams,
        )(x_bcl, g2, b2)
        return out

    # Packed path needs the per-tile row count (tile_l*C/128) to satisfy the
    # (8, 128) block constraint, i.e. tile_l*C % 1024 == 0.
    if (tile_l * C) % 1024 == 0:
        try:
            out = run_packed()
        except Exception:
            # Conservative guard: if the compiler cannot lower the in-kernel
            # (tile_l, C) -> (tile_l*C/128, 128) repack, fall back to the
            # proven row-major store layout rather than failing.
            out = run_rowmajor()
    else:
        out = run_rowmajor()

    if Lp != L:
        out = out[:, :L, :]
    return out


if __name__ == "__main__":
    # Small shapes: batch=2, embed_dim=32, spatial 16x16 -> L=256 tokens.
    B, C, H, W = 2, 32, 16, 16

    key = jax.random.PRNGKey(0)
    k0, k1 = jax.random.split(key)
    x = jax.random.normal(k0, (B, C, H, W), dtype=jnp.float32)

    # Deterministic in-script LayerNorm(embed_dim) parameters.
    gamma = 1.0 + 0.01 * jnp.arange(C, dtype=jnp.float32)
    beta = 0.001 * jnp.arange(C, dtype=jnp.float32)

    def reference(x_nchw):
        b, c, h, w = x_nchw.shape
        xt = jnp.transpose(x_nchw.reshape(b, c, h * w), (0, 2, 1))
        m = jnp.mean(xt, axis=-1, keepdims=True)
        v = jnp.mean((xt - m) ** 2, axis=-1, keepdims=True)
        return (xt - m) * jax.lax.rsqrt(v + _LN_EPS) * gamma + beta, xt

    # 1) LayerNorm path.
    out = jax.block_until_ready(patch_embed_forward(x, gamma, beta))
    ref, x_tok = reference(x)
    assert out.shape == (B, H * W, C)
    assert jnp.allclose(out, ref, atol=1e-4, rtol=1e-4)

    # 2) norm_layer=None path (pure flatten/transpose glue).
    out_nonorm = jax.block_until_ready(patch_embed_forward(x))
    assert out_nonorm.shape == (B, H * W, C)
    assert jnp.allclose(out_nonorm, x_tok)

    # 3) Non-128-aligned spatial size (exercises the L-padding path).
    H2 = W2 = 10
    x2 = jax.random.normal(k1, (B, C, H2, W2), dtype=jnp.float32)
    out2 = jax.block_until_ready(patch_embed_forward(x2, gamma, beta))
    ref2, _ = reference(x2)
    assert out2.shape == (B, H2 * W2, C)
    assert jnp.allclose(out2, ref2, atol=1e-4, rtol=1e-4)

    print("KERNEL_OK")
</pallas_src>

<mosaic_0001>
module attributes {stable_mosaic.version = 11 : i64} {
  func.func @_ln_kernel(%arg0: i32, %arg1: i32, %arg2: memref<1x32x256xf32, #tpu.memory_space<vmem>>, %arg3: memref<32x1xf32, #tpu.memory_space<vmem>>, %arg4: memref<32x1xf32, #tpu.memory_space<vmem>>, %arg5: memref<1x64x128xf32, #tpu.memory_space<vmem>>) attributes {dimension_semantics = [#tpu.dimension_semantics<parallel>, #tpu.dimension_semantics<parallel>], iteration_bounds = array<i64: 2, 1>, scalar_prefetch = 0 : i64, scratch_operands = 0 : i64, tpu.core_type = #tpu.core_type<tc>, window_params = [{transform_indices = @transform_0, window_bounds = array<i64: 1, 32, 256>}, {pipeline_mode = #tpu.pipeline_mode<synchronous>, transform_indices = @transform_1, window_bounds = array<i64: 32, 1>}, {pipeline_mode = #tpu.pipeline_mode<synchronous>, transform_indices = @transform_2, window_bounds = array<i64: 32, 1>}, {transform_indices = @transform_3, window_bounds = array<i64: 1, 64, 128>}]} {
    %c0 = arith.constant 0 : index
    %c0_0 = arith.constant 0 : index
    %c0_1 = arith.constant 0 : index
    %0 = vector.load %arg2[%c0, %c0_0, %c0_1] : memref<1x32x256xf32, #tpu.memory_space<vmem>>, vector<1x32x256xf32>
    %1 = vector.shape_cast %0 : vector<1x32x256xf32> to vector<32x256xf32>
    %cst = arith.constant dense<0.000000e+00> : vector<256xf32>
    %2 = vector.multi_reduction <add>, %1, %cst [0] : vector<32x256xf32> to vector<256xf32>
    %3 = vector.shape_cast %2 : vector<256xf32> to vector<1x256xf32>
    %4 = arith.mulf %1, %1 : vector<32x256xf32>
    %cst_2 = arith.constant dense<0.000000e+00> : vector<256xf32>
    %5 = vector.multi_reduction <add>, %4, %cst_2 [0] : vector<32x256xf32> to vector<256xf32>
    %6 = vector.shape_cast %5 : vector<256xf32> to vector<1x256xf32>
    %cst_3 = arith.constant 3.125000e-02 : f32
    %7 = vector.broadcast %cst_3 : f32 to vector<1x256xf32>
    %8 = arith.mulf %3, %7 : vector<1x256xf32>
    %cst_4 = arith.constant 3.125000e-02 : f32
    %9 = vector.broadcast %cst_4 : f32 to vector<1x256xf32>
    %10 = arith.mulf %6, %9 : vector<1x256xf32>
    %11 = arith.mulf %8, %8 : vector<1x256xf32>
    %12 = arith.subf %10, %11 : vector<1x256xf32>
    %cst_5 = arith.constant 0.000000e+00 : f32
    %13 = vector.broadcast %cst_5 : f32 to vector<1x256xf32>
    %14 = arith.maximumf %12, %13 : vector<1x256xf32>
    %15 = vector.broadcast %8 : vector<1x256xf32> to vector<32x256xf32>
    %16 = arith.subf %1, %15 : vector<32x256xf32>
    %cst_6 = arith.constant 9.99999974E-6 : f32
    %17 = vector.broadcast %cst_6 : f32 to vector<1x256xf32>
    %18 = arith.addf %14, %17 : vector<1x256xf32>
    %19 = math.rsqrt %18 : vector<1x256xf32>
    %20 = vector.broadcast %19 : vector<1x256xf32> to vector<32x256xf32>
    %21 = arith.mulf %16, %20 : vector<32x256xf32>
    %c0_7 = arith.constant 0 : index
    %c0_8 = arith.constant 0 : index
    %22 = vector.load %arg3[%c0_7, %c0_8] : memref<32x1xf32, #tpu.memory_space<vmem>>, vector<32x1xf32>
    %23 = vector.broadcast %22 : vector<32x1xf32> to vector<32x256xf32>
    %24 = arith.mulf %21, %23 : vector<32x256xf32>
    %c0_9 = arith.constant 0 : index
    %c0_10 = arith.constant 0 : index
    %25 = vector.load %arg4[%c0_9, %c0_10] : memref<32x1xf32, #tpu.memory_space<vmem>>, vector<32x1xf32>
    %26 = vector.broadcast %25 : vector<32x1xf32> to vector<32x256xf32>
    %27 = arith.addf %24, %26 : vector<32x256xf32>
    %28 = tpu.transpose %27, [1, 0] : vector<32x256xf32> -> vector<256x32xf32>
    %29 = vector.shape_cast %28 : vector<256x32xf32> to vector<64x128xf32>
    %c0_11 = arith.constant 0 : index
    %c0_12 = arith.constant 0 : index
    %c0_13 = arith.constant 0 : index
    %30 = vector.load %arg5[%c0_11, %c0_12, %c0_13] : memref<1x64x128xf32, #tpu.memory_space<vmem>>, vector<1x64x128xf32>
    %31 = vector.shape_cast %30 : vector<1x64x128xf32> to vector<64x128xf32>
    %32 = vector.shape_cast %29 : vector<64x128xf32> to vector<1x64x128xf32>
    tpu.vector_store %arg5[%c0_11, %c0_12, %c0_13], %32 {strides = array<i32>} : memref<1x64x128xf32, #tpu.memory_space<vmem>>, vector<1x64x128xf32>,
    return
  }
  func.func @transform_0(%arg0: i32, %arg1: i32) -> (i32, i32, i32) {
    %c0_i32 = arith.constant 0 : i32
    %c0_i32_0 = arith.constant 0 : i32
    return %arg0, %c0_i32, %arg1 : i32, i32, i32
  }
  func.func @transform_1(%arg0: i32, %arg1: i32) -> (i32, i32) {
    %c0_i32 = arith.constant 0 : i32
    %c0_i32_0 = arith.constant 0 : i32
    %c0_i32_1 = arith.constant 0 : i32
    return %c0_i32, %c0_i32_0 : i32, i32
  }
  func.func @transform_2(%arg0: i32, %arg1: i32) -> (i32, i32) {
    %c0_i32 = arith.constant 0 : i32
    %c0_i32_0 = arith.constant 0 : i32
    %c0_i32_1 = arith.constant 0 : i32
    return %c0_i32, %c0_i32_0 : i32, i32
  }
  func.func @transform_3(%arg0: i32, %arg1: i32) -> (i32, i32, i32) {
    %c0_i32 = arith.constant 0 : i32
    %c0_i32_0 = arith.constant 0 : i32
    return %arg0, %arg1, %c0_i32 : i32, i32, i32
  }
}

module attributes {stable_mosaic.version = 11 : i64} {
  func.func @_ln_kernel(%arg0: i32, %arg1: i32, %arg2: memref<1x32x256xf32, #tpu.memory_space<vmem>>, %arg3: memref<32x1xf32, #tpu.memory_space<vmem>>, %arg4: memref<32x1xf32, #tpu.memory_space<vmem>>, %arg5: memref<1x256x32xf32, #tpu.memory_space<vmem>>) attributes {dimension_semantics = [#tpu.dimension_semantics<parallel>, #tpu.dimension_semantics<parallel>], iteration_bounds = array<i64: 2, 1>, scalar_prefetch = 0 : i64, scratch_operands = 0 : i64, tpu.core_type = #tpu.core_type<tc>, window_params = [{transform_indices = @transform_0, window_bounds = array<i64: 1, 32, 256>}, {pipeline_mode = #tpu.pipeline_mode<synchronous>, transform_indices = @transform_1, window_bounds = array<i64: 32, 1>}, {pipeline_mode = #tpu.pipeline_mode<synchronous>, transform_indices = @transform_2, window_bounds = array<i64: 32, 1>}, {transform_indices = @transform_3, window_bounds = array<i64: 1, 256, 32>}]} {
    %c0 = arith.constant 0 : index
    %c0_0 = arith.constant 0 : index
    %c0_1 = arith.constant 0 : index
    %0 = vector.load %arg2[%c0, %c0_0, %c0_1] : memref<1x32x256xf32, #tpu.memory_space<vmem>>, vector<1x32x256xf32>
    %1 = vector.shape_cast %0 : vector<1x32x256xf32> to vector<32x256xf32>
    %cst = arith.constant dense<0.000000e+00> : vector<256xf32>
    %2 = vector.multi_reduction <add>, %1, %cst [0] : vector<32x256xf32> to vector<256xf32>
    %3 = vector.shape_cast %2 : vector<256xf32> to vector<1x256xf32>
    %4 = arith.mulf %1, %1 : vector<32x256xf32>
    %cst_2 = arith.constant dense<0.000000e+00> : vector<256xf32>
    %5 = vector.multi_reduction <add>, %4, %cst_2 [0] : vector<32x256xf32> to vector<256xf32>
    %6 = vector.shape_cast %5 : vector<256xf32> to vector<1x256xf32>
    %cst_3 = arith.constant 3.125000e-02 : f32
    %7 = vector.broadcast %cst_3 : f32 to vector<1x256xf32>
    %8 = arith.mulf %3, %7 : vector<1x256xf32>
    %cst_4 = arith.constant 3.125000e-02 : f32
    %9 = vector.broadcast %cst_4 : f32 to vector<1x256xf32>
    %10 = arith.mulf %6, %9 : vector<1x256xf32>
    %11 = arith.mulf %8, %8 : vector<1x256xf32>
    %12 = arith.subf %10, %11 : vector<1x256xf32>
    %cst_5 = arith.constant 0.000000e+00 : f32
    %13 = vector.broadcast %cst_5 : f32 to vector<1x256xf32>
    %14 = arith.maximumf %12, %13 : vector<1x256xf32>
    %15 = vector.broadcast %8 : vector<1x256xf32> to vector<32x256xf32>
    %16 = arith.subf %1, %15 : vector<32x256xf32>
    %cst_6 = arith.constant 9.99999974E-6 : f32
    %17 = vector.broadcast %cst_6 : f32 to vector<1x256xf32>
    %18 = arith.addf %14, %17 : vector<1x256xf32>
    %19 = math.rsqrt %18 : vector<1x256xf32>
    %20 = vector.broadcast %19 : vector<1x256xf32> to vector<32x256xf32>
    %21 = arith.mulf %16, %20 : vector<32x256xf32>
    %c0_7 = arith.constant 0 : index
    %c0_8 = arith.constant 0 : index
    %22 = vector.load %arg3[%c0_7, %c0_8] : memref<32x1xf32, #tpu.memory_space<vmem>>, vector<32x1xf32>
    %23 = vector.broadcast %22 : vector<32x1xf32> to vector<32x256xf32>
    %24 = arith.mulf %21, %23 : vector<32x256xf32>
    %c0_9 = arith.constant 0 : index
    %c0_10 = arith.constant 0 : index
    %25 = vector.load %arg4[%c0_9, %c0_10] : memref<32x1xf32, #tpu.memory_space<vmem>>, vector<32x1xf32>
    %26 = vector.broadcast %25 : vector<32x1xf32> to vector<32x256xf32>
    %27 = arith.addf %24, %26 : vector<32x256xf32>
    %28 = tpu.transpose %27, [1, 0] : vector<32x256xf32> -> vector<256x32xf32>
    %c0_11 = arith.constant 0 : index
    %c0_12 = arith.constant 0 : index
    %c0_13 = arith.constant 0 : index
    %29 = vector.load %arg5[%c0_11, %c0_12, %c0_13] : memref<1x256x32xf32, #tpu.memory_space<vmem>>, vector<1x256x32xf32>
    %30 = vector.shape_cast %29 : vector<1x256x32xf32> to vector<256x32xf32>
    %31 = vector.shape_cast %28 : vector<256x32xf32> to vector<1x256x32xf32>
    tpu.vector_store %arg5[%c0_11, %c0_12, %c0_13], %31 {strides = array<i32>} : memref<1x256x32xf32, #tpu.memory_space<vmem>>, vector<1x256x32xf32>,
    return
  }
  func.func @transform_0(%arg0: i32, %arg1: i32) -> (i32, i32, i32) {
    %c0_i32 = arith.constant 0 : i32
    %c0_i32_0 = arith.constant 0 : i32
    return %arg0, %c0_i32, %arg1 : i32, i32, i32
  }
  func.func @transform_1(%arg0: i32, %arg1: i32) -> (i32, i32) {
    %c0_i32 = arith.constant 0 : i32
    %c0_i32_0 = arith.constant 0 : i32
    %c0_i32_1 = arith.constant 0 : i32
    return %c0_i32, %c0_i32_0 : i32, i32
  }
  func.func @transform_2(%arg0: i32, %arg1: i32) -> (i32, i32) {
    %c0_i32 = arith.constant 0 : i32
    %c0_i32_0 = arith.constant 0 : i32
    %c0_i32_1 = arith.constant 0 : i32
    return %c0_i32, %c0_i32_0 : i32, i32
  }
  func.func @transform_3(%arg0: i32, %arg1: i32) -> (i32, i32, i32) {
    %c0_i32 = arith.constant 0 : i32
    %c0_i32_0 = arith.constant 0 : i32
    return %arg0, %arg1, %c0_i32 : i32, i32, i32
  }
}

</mosaic_0001>

<bundles_post_ra>
// kernel: tpu_custom_call.1
= control target key start
LH: loop header
LB: loop body
LE: loop exit
PB: predicated region body
PF: predicated region fallthrough
CT: control target
= control target key end

     0   :  { %8 = vsyncpa [#allocation3], 0  ;;  %s1015_s0 = inlined_call_operand.hbm [shape: f32[2,32,256], index: 0, kind: input, shape index: {}]   ;;  %s1016_s1 = inlined_call_operand.vmem [shape: f32[32,1], index: 1, kind: input, shape index: {}]   ;;  %s1017_s2 = inlined_call_operand.vmem [shape: f32[32,1], index: 2, kind: input, shape index: {}]   ;;  %s1018_s3 = inlined_call_operand.vmem [shape: f32[2,256,32], index: 3, kind: output, shape index: {}]  }
   0x1   :  { %10 = vsyncpa [#allocation3 + $0x1], 0  ;;  %s763_s12 = smov 0   ;;  %s765_s13 = smov 0  }
   0x2   :  { %s767_s14 = smov 0   ;;  %s769_s15 = smov 0  }
   0x3   :  { %s771_s16 = smov 0   ;;  %s773_s17 = smov 0  }
   0x4 LB: > { %s577_s18 = sadd.s32 4294967295, %s738_s17   ;;  %s28_s19 = sadd.s32 1, %s734_s16  ;;  %s738_s17 = sphi %s773_s17, %s16_s17   ;;  %s734_s16 = sphi %s771_s16, %s1025_s16   ;;  %s730_s15 = sphi %s769_s15, %s1024_s15   ;;  %s726_s14 = sphi %s767_s14, %s1023_s14   ;;  %s722_s13 = sphi %s765_s13, %s1022_s13   ;;  %s718_s12 = sphi %s763_s12, %s1021_s12  }
   0x5   : > { %p30_p0 = scmp.ge.s32.totalorder %s28_s19, 2  ;;  %s37_s20 = sadd.s32 1, %s726_s14 }
   0x6   : > { %p44_p1 = scmp.ne.s32.totalorder %s726_s14, %s722_s13  ;;  %p45_p2 = scmp.eq.s32.totalorder %s738_s17, 0 }
   0x7   : > { %s1027_s19 = smov (%p30_p0, %s28_s19), 0  ;;  %p50_p4 = scmp.ne.s32.totalorder %s722_s13, %s718_s12 }
   0x8   : > { %p799_p3 = por %p45_p2, %p44_p1  ;;  %s32_s22 = ssub.s32 %s734_s16, %s1027_s19 }
   0x9   : > { %p51_p5 = scmp.eq.s32.totalorder %s577_s18, 0  ;;  %p35_p6 = scmp.eq.s32.totalorder %s32_s22, 0 }
   0xa   : > { %p598_p8 = scmp.lt.s32.totalorder %s738_s17, 2  ;;  %s150_s25 = sand.u32 1, %s726_s14  }
   0xb   : > { %p806_p7 = por %p51_p5, %p50_p4  ;;  %s590_s26 = sshll.u32 %s734_s16, 6 }
   0xc   : > { %s812_s24 = scalar_select %p35_p6, %s726_s14, %s37_s20  }
   0xd   : > { %s581_s27 = sshll.u32 %s150_s25, 6  ;;  %s161_s30 = scalar_lea.hbm %s1015_s0, %s590_s26 }
   0xe   : > { %s162_s4 = sshll.u32 %s161_s30, 4  ;;  %s154_s5 = scalar_lea.vmem [#allocation2], %s581_s27  ;;  %s163_s4 = int_to_ptr.hbm [resolvable:$true] %s162_s4 }
   0xf   : > { %s164_s6 = sshll.u32 %s154_s5, 4  ;;  %p595_p9 = pnand %p598_p8, %p799_p3  ;;  %s165_s6 = int_to_ptr.vmem [resolvable:$true] %s164_s6 }
  0x10   : > { %p584_p10 = scmp.ge.s32.totalorder %s738_s17, 1  ;;  %p172_p11 = scmp.lt.s32.totalorder %s738_s17, 3 }
  0x11   : > { %s151_s7 = scalar_lea.sflag [#allocation3], %s150_s25  ;;  %s740_s8 = smov 256  }
  0x12   : > { %s741_s9 = smov 16   ;;  %p173_p12 = pnand %p584_p10, %p172_p11 }
  0x13   : > { %597 = dma.hbm_to_vmem [thread:$0]  (!%p595_p9), %s163_s4, 1024, %s165_s6, %s151_s7, %s740_s8, %s740_s8, %s741_s9  }
  0x14   : > { %176 = sbr.rel (%p173_p12) target bundleno = 440 (0x1b8), region = 32  ;;  %s178_s10 = sand.u32 (!%p173_p12), 1, %s722_s13  }
  0x15   : > { %s585_s11 = sshll.u32 (!%p173_p12), %s178_s10, 6  ;;  %s179_s12 = scalar_lea.sflag (!%p173_p12), [#allocation3], %s178_s10 }
  0x16   : > { %s824_s18 = scalar_lea.vmem (!%p173_p12), [#allocation2], %s585_s11 }
  0x19   : > { %713 = dma.done.wait (%p806_p7), %s179_s12, 1024  }
  0x1a   : > { %715 = vsyncadd (%p806_p7), %s179_s12, 4294966272  ;;  %v742_v0 = vmov 0   ;;  %v322_v1 = vld [vmem:[%s1016_s1 + $0x8] sm:$0xff]  ;;  %v321_v2 = vld [vmem:[%s1016_s1] sm:$0xff]  ;;  %p212_p13 = scmp.lt.s32.totalorder %s730_s15, 1  ;;  %vm449_vm6 = vcmask 261120  }
  0x1b   : > { %652 = vset.pattern.permute.xlu1 %v742_v0  ;;  %651 = vset.pattern.permute.xlu0 %v742_v0  ;;  %v323_v3 = vld [vmem:[%s1016_s1 + $0x10] sm:$0xff]  ;;  %v354_v4 = vld [vmem:[%s1017_s2 + $0x8] sm:$0xff]  ;;  %v353_v5 = vld [vmem:[%s1017_s2] sm:$0xff] }
  0x1c   : > { %653 = vset.pattern.permute.xlu2 %v742_v0  ;;  %332 = vperm.xlu1 %652, %v322_v1   ;;  %v355_v6 = vld [vmem:[%s1017_s2 + $0x10] sm:$0xff]  ;;  %v356_v7 = vld [vmem:[%s1017_s2 + $0x18] sm:$0xff]  ;;  %v855_v9 = vld [vmem:[%s824_s18] sm:$0xff]  ;;  %s1029_s15 = smov (!%p212_p13, %s730_s15), 1 }
  0x1d   : > { %327 = vperm.xlu0 %651, %v321_v2   ;;  %337 = vperm.xlu2 %653, %v323_v3   ;;  %v324_v8 = vld [vmem:[%s1016_s1 + $0x18] sm:$0xff]  ;;  %v858_v10 = vld [vmem:[%s824_s18 + $0x8] sm:$0xff]  ;;  %v861_v11 = vld [vmem:[%s824_s18 + $0x10] sm:$0xff]  ;;  %v247_v14 = vmul.f32 %v855_v9, %v855_v9  ;;  %s591_s10 = sshll.u32 %s1029_s15, 8 }
  0x1e   : > { %v864_v12 = vld [vmem:[%s824_s18 + $0x18] sm:$0xff]  ;;  %v229_v13 = vadd.f32 %v861_v11, %v855_v9  ;;  %v248_v15 = vmul.f32 %v858_v10, %v858_v10  ;;  %v249_v16 = vmul.f32 %v861_v11, %v861_v11  ;;  %v875_v17 = vld [vmem:[%s824_s18 + $0x20] sm:$0xff]  ;;  %v878_v18 = vld [vmem:[%s824_s18 + $0x28] sm:$0xff] }
  0x1f   : > { %v238_v19 = vadd.f32 %v864_v12, %v858_v10  ;;  %v250_v20 = vmul.f32 %v864_v12, %v864_v12  ;;  %v251_v22 = vmul.f32 %v875_v17, %v875_v17  ;;  %v252_v23 = vmul.f32 %v878_v18, %v878_v18  ;;  %v890_v25 = vld [vmem:[%s824_s18 + $0x30] sm:$0xff]  ;;  %v893_v26 = vld [vmem:[%s824_s18 + $0x38] sm:$0xff]  ;;  %s931_s18 = scalar_lea.vmem %s1018_s3, %s591_s10 }
  0x20   : > { %v230_v21 = vadd.f32 %v229_v13, %v875_v17  ;;  %v255_v24 = vadd.f32 %v249_v16, %v247_v14  ;;  %v253_v30 = vmul.f32 %v890_v25, %v890_v25  ;;  %v254_v31 = vmul.f32 %v893_v26, %v893_v26 }
  0x21   : > { %v239_v27 = vadd.f32 %v238_v19, %v878_v18  ;;  %v264_v28 = vadd.f32 %v250_v20, %v248_v15 }
  0x22   : > { %v231_v29 = vadd.f32 %v230_v21, %v890_v25  ;;  %v256_v32 = vadd.f32 %v255_v24, %v251_v22 }
  0x23   : > { %v240_v33 = vadd.f32 %v239_v27, %v893_v26  ;;  %v265_v34 = vadd.f32 %v264_v28, %v252_v23 }
  0x24   : > { %364 = vperm.xlu1 %652, %v354_v4   ;;  %v232_v35 = vrot.slane %v231_v29, 4  ;;  %v257_v36 = vadd.f32 %v256_v32, %v253_v30 }
  0x25   : > { %359 = vperm.xlu0 %651, %v353_v5   ;;  %369 = vperm.xlu2 %653, %v355_v6   ;;  %v241_v37 = vrot.slane %v240_v33, 4  ;;  %v266_v38 = vadd.f32 %v265_v34, %v254_v31 }
  0x26   : > { %v233_v39 = vadd.f32 %v232_v35, %v231_v29  ;;  %v258_v40 = vrot.slane %v257_v36, 4 }
  0x27   : > { %v242_v41 = vadd.f32 %v241_v37, %v240_v33  ;;  %v267_v42 = vrot.slane %v266_v38, 4 }
  0x28   : > { %v234_v43 = vrot.slane %v233_v39, 2  ;;  %v259_v44 = vadd.f32 %v258_v40, %v257_v36 }
  0x29   : > { %v243_v45 = vrot.slane %v242_v41, 2  ;;  %v268_v46 = vadd.f32 %v267_v42, %v266_v38 }
  0x2a   : > { %v235_v47 = vadd.f32 %v234_v43, %v233_v39  ;;  %v260_v48 = vrot.slane %v259_v44, 2 }
  0x2b   : > { %v244_v49 = vadd.f32 %v243_v45, %v242_v41  ;;  %v269_v50 = vrot.slane %v268_v46, 2 }
  0x2c   : > { %374 = vperm.xlu1 %652, %v356_v7   ;;  %v236_v51 = vrot.slane %v235_v47, 1  ;;  %v261_v52 = vadd.f32 %v260_v48, %v259_v44 }
  0x2d   : > { %342 = vperm.xlu0 %651, %v324_v8   ;;  %v245_v53 = vrot.slane %v244_v49, 1  ;;  %v270_v54 = vadd.f32 %v269_v50, %v268_v46 }
  0x2e   : > { %v237_v55 = vadd.f32 %v236_v51, %v235_v47  ;;  %v262_v56 = vrot.slane %v261_v52, 1 }
  0x2f   : > { %v246_v57 = vadd.f32 %v245_v53, %v244_v49  ;;  %v271_v58 = vrot.slane %v270_v54, 1 }
  0x30   : > { %v263_v59 = vadd.f32 %v262_v56, %v261_v52  ;;  %v902_v60 = vmul.f32 0.03125, %v237_v55 }
  0x31   : > { %v272_v61 = vadd.f32 %v271_v58, %v270_v54  ;;  %v904_v62 = vmul.f32 0.03125, %v246_v57 }
  0x32   : > { %v275_v63 = vmul.f32 0.03125, %v263_v59  ;;  %v277_v0 = vmul.f32 %v902_v60, %v902_v60  ;;  %v283_v29 = vsub.f32 %v855_v9, %v902_v60  ;;  %v285_v37 = vsub.f32 %v861_v11, %v902_v60 }
  0x33   : > { %v276_v1 = vmul.f32 0.03125, %v272_v61  ;;  %v278_v2 = vmul.f32 %v904_v62, %v904_v62  ;;  %v284_v30 = vsub.f32 %v858_v10, %v904_v62  ;;  %v286_v38 = vsub.f32 %v864_v12, %v904_v62 }
  0x34   : > { %v279_v3 = vsub.f32 %v275_v63, %v277_v0  ;;  %v287_v47 = vsub.f32 %v875_v17, %v902_v60  ;;  %v288_v11 = vsub.f32 %v878_v18, %v904_v62  ;;  %v289_v54 = vsub.f32 %v890_v25, %v902_v60 }
  0x35   : > { %v280_v4 = vsub.f32 %v276_v1, %v278_v2  ;;  %v290_v55 = vsub.f32 %v893_v26, %v904_v62 }
  0x36   : > { %v281_v5 = vmax.f32 %v279_v3, 0.0 }
  0x37   : > { %v282_v6 = vmax.f32 %v280_v4, 0.0 }
  0x38   : > { %v291_v7 = vadd.f32 1e-05, %v281_v5 }
  0x39   : > { %v292_v8 = vadd.f32 1e-05, %v282_v6 }
  0x3a   : > { %654 = vrsqrt.f32 %v291_v7  ;;  %vm299_vm0 = vweird.f32 %v291_v7 }
  0x3b   : > { %656 = vrsqrt.f32 %v292_v8  ;;  %vm309_vm2 = vweird.f32 %v292_v8 }
  0x40   : > { %v655_v13 = vpop.eup %654 }
  0x41   : > { %v657_v14 = vpop.eup %656  ;;  %v294_v15 = vmul.f32 %v655_v13, %v291_v7  ;;  %vm300_vm1 = vweird.f32 %v655_v13 }
  0x42   : > { %v304_v16 = vmul.f32 %v657_v14, %v292_v8  ;;  %vm310_vm3 = vweird.f32 %v657_v14  ;;  %vm301_vm4 = vmor %vm299_vm0, %vm300_vm1 }
  0x43   : > { %v295_v19 = vmul.f32 %v655_v13, %v294_v15  ;;  %vm311_vm5 = vmor %vm309_vm2, %vm310_vm3 }
  0x44   : > { %v305_v20 = vmul.f32 %v657_v14, %v304_v16 }
  0x45   : > { %v296_v21 = vmul.f32 0.5, %v295_v19 }
  0x46   : > { %v306_v22 = vmul.f32 0.5, %v305_v20 }
  0x47   : > { %v297_v23 = vsub.f32 1.5, %v296_v21 }
  0x48   : > { %v307_v24 = vsub.f32 1.5, %v306_v22 }
  0x49   : > { %v298_v27 = vmul.f32 %v655_v13, %v297_v23 }
  0x4a   : > { %v308_v28 = vmul.f32 %v657_v14, %v307_v24 }
  0x4b   : > { %v302_v31 = vsel %vm301_vm4, %v655_v13, %v298_v27 }
  0x4c   : > { %v312_v32 = vsel %vm311_vm5, %v657_v14, %v308_v28  ;;  %v313_v34 = vmul.f32 %v302_v31, %v283_v29  ;;  %v315_v42 = vmul.f32 %v302_v31, %v285_v37  ;;  %v317_v12 = vmul.f32 %v302_v31, %v287_v47 }
  0x4d   : > { %v314_v35 = vmul.f32 %v312_v32, %v284_v30  ;;  %v316_v9 = vmul.f32 %v312_v32, %v286_v38  ;;  %v318_v49 = vmul.f32 %v312_v32, %v288_v11  ;;  %v319_v57 = vmul.f32 %v302_v31, %v289_v54 }
  0x4e   : > { %v320_v58 = vmul.f32 %v312_v32, %v290_v55 }
  0x77   : > { %v338_v10 = vpop.permute.xlu2 %337 }
  0x78   : > { %v349_v52 = vmul.f32 %v338_v10, %v317_v12  ;;  %v350_v53 = vmul.f32 %v338_v10, %v318_v49 }
  0x7f   : > { %v370_v17 = vpop.permute.xlu2 %369 }
  0x80   : > { %v381_v56 = vadd.f32 %v370_v17, %v349_v52  ;;  %v382_v18 = vadd.f32 %v370_v17, %v350_v53 }
  0x8e   : > { %v333_v36 = vpop.permute.xlu1 %332 }
  0x8f   : > { %v328_v33 = vpop.permute.xlu0 %327  ;;  %v347_v45 = vmul.f32 %v333_v36, %v315_v42  ;;  %v348_v46 = vmul.f32 %v333_v36, %v316_v9 }
  0x90   : > { %v345_v39 = vmul.f32 %v328_v33, %v313_v34  ;;  %v346_v40 = vmul.f32 %v328_v33, %v314_v35 }
  0x96   : > { %v365_v48 = vpop.permute.xlu1 %364 }
  0x97   : > { %v360_v41 = vpop.permute.xlu0 %359  ;;  %v379_v50 = vadd.f32 %v365_v48, %v347_v45  ;;  %v380_v51 = vadd.f32 %v365_v48, %v348_v46 }
  0x98   : > { %v377_v43 = vadd.f32 %v360_v41, %v345_v39  ;;  %v378_v44 = vadd.f32 %v360_v41, %v346_v40 }
  0x9a   : > { %417 = vxpose.xlu0.b32.start [1/4] (short) %v378_v44, 128  ;;  %385 = vxpose.xlu2.b32.start [1/4] (short) %v377_v43, 128 }
  0x9e   : > { %v375_v0 = vpop.permute.xlu1 %374 }
  0x9f   : > { %v343_v59 = vpop.permute.xlu0 %342 }
  0xa0   : > { %v351_v61 = vmul.f32 %v343_v59, %v319_v57  ;;  %v352_v63 = vmul.f32 %v343_v59, %v320_v58 }
  0xa2   : > { %418 = vxpose.xlu0.b32.cont [2/4] (short) %v380_v51, 128  ;;  %386 = vxpose.xlu2.b32.cont [2/4] (short) %v379_v50, 128  ;;  %v383_v1 = vadd.f32 %v375_v0, %v351_v61  ;;  %v384_v2 = vadd.f32 %v375_v0, %v352_v63 }
  0xaa   : > { %419 = vxpose.xlu0.b32.cont [3/4] (short) %v382_v18, 128  ;;  %387 = vxpose.xlu2.b32.cont [3/4] (short) %v381_v56, 128 }
  0xb2   : > { %420 = vxpose.xlu0.b32.end [4/4] (short) %v384_v2, 128  ;;  %388 = vxpose.xlu2.b32.end [4/4] (short) %v383_v1, 128 }
 0x133   : > { %v401_v25 = vpop.trf.xlu2 }
 0x134   : > { %450 = vst.msk [vmem:[%s931_s18] sm:$0xff] %vm449_vm6, %v401_v25 }
 0x13b   : > { %v402_v26 = vpop.trf.xlu2 }
 0x13c   : > { %451 = vst.msk [vmem:[%s931_s18 + $0x8] sm:$0xff] %vm449_vm6, %v402_v26 }
 0x13e   : > { %v433_v60 = vpop.trf.xlu0 }
 0x13f   : > { %466 = vst.msk [vmem:[%s931_s18 + $0x80] sm:$0xff] %vm449_vm6, %v433_v60 }
 0x143   : > { %v403_v62 = vpop.trf.xlu2 }
 0x144   : > { %452 = vst.msk [vmem:[%s931_s18 + $0x10] sm:$0xff] %vm449_vm6, %v403_v62 }
 0x146   : > { %v434_v3 = vpop.trf.xlu0 }
 0x147   : > { %467 = vst.msk [vmem:[%s931_s18 + $0x88] sm:$0xff] %vm449_vm6, %v434_v3 }
 0x14b   : > { %v404_v4 = vpop.trf.xlu2 }
 0x14c   : > { %453 = vst.msk [vmem:[%s931_s18 + $0x18] sm:$0xff] %vm449_vm6, %v404_v4 }
 0x14e   : > { %v435_v5 = vpop.trf.xlu0 }
 0x14f   : > { %468 = vst.msk [vmem:[%s931_s18 + $0x90] sm:$0xff] %vm449_vm6, %v435_v5 }
 0x153   : > { %v405_v6 = vpop.trf.xlu2 }
 0x154   : > { %454 = vst.msk [vmem:[%s931_s18 + $0x20] sm:$0xff] %vm449_vm6, %v405_v6 }
 0x156   : > { %v436_v7 = vpop.trf.xlu0 }
 0x157   : > { %469 = vst.msk [vmem:[%s931_s18 + $0x98] sm:$0xff] %vm449_vm6, %v436_v7 }
 0x15b   : > { %v406_v8 = vpop.trf.xlu2 }
 0x15c   : > { %455 = vst.msk [vmem:[%s931_s18 + $0x28] sm:$0xff] %vm449_vm6, %v406_v8 }
 0x15e   : > { %v437_v13 = vpop.trf.xlu0 }
 0x15f   : > { %470 = vst.msk [vmem:[%s931_s18 + $0xa0] sm:$0xff] %vm449_vm6, %v437_v13 }
 0x163   : > { %v407_v14 = vpop.trf.xlu2 }
 0x164   : > { %456 = vst.msk [vmem:[%s931_s18 + $0x30] sm:$0xff] %vm449_vm6, %v407_v14 }
 0x166   : > { %v438_v15 = vpop.trf.xlu0 }
 0x167   : > { %471 = vst.msk [vmem:[%s931_s18 + $0xa8] sm:$0xff] %vm449_vm6, %v438_v15 }
 0x16b   : > { %v408_v16 = vpop.trf.xlu2 }
 0x16c   : > { %457 = vst.msk [vmem:[%s931_s18 + $0x38] sm:$0xff] %vm449_vm6, %v408_v16 }
 0x16e   : > { %v439_v19 = vpop.trf.xlu0 }
 0x16f   : > { %472 = vst.msk [vmem:[%s931_s18 + $0xb0] sm:$0xff] %vm449_vm6, %v439_v19 }
 0x173   : > { %v409_v20 = vpop.trf.xlu2 }
 0x174   : > { %458 = vst.msk [vmem:[%s931_s18 + $0x40] sm:$0xff] %vm449_vm6, %v409_v20 }
 0x176   : > { %v440_v21 = vpop.trf.xlu0 }
 0x177   : > { %473 = vst.msk [vmem:[%s931_s18 + $0xb8] sm:$0xff] %vm449_vm6, %v440_v21 }
 0x17b   : > { %v410_v22 = vpop.trf.xlu2 }
 0x17c   : > { %459 = vst.msk [vmem:[%s931_s18 + $0x48] sm:$0xff] %vm449_vm6, %v410_v22 }
 0x17e   : > { %v441_v23 = vpop.trf.xlu0 }
 0x17f   : > { %474 = vst.msk [vmem:[%s931_s18 + $0xc0] sm:$0xff] %vm449_vm6, %v441_v23 }
 0x183   : > { %v411_v24 = vpop.trf.xlu2 }
 0x184   : > { %460 = vst.msk [vmem:[%s931_s18 + $0x50] sm:$0xff] %vm449_vm6, %v411_v24 }
 0x186   : > { %v442_v27 = vpop.trf.xlu0 }
 0x187   : > { %475 = vst.msk [vmem:[%s931_s18 + $0xc8] sm:$0xff] %vm449_vm6, %v442_v27 }
 0x18b   : > { %v412_v28 = vpop.trf.xlu2 }
 0x18c   : > { %461 = vst.msk [vmem:[%s931_s18 + $0x58] sm:$0xff] %vm449_vm6, %v412_v28 }
 0x18e   : > { %v443_v29 = vpop.trf.xlu0 }
 0x18f   : > { %476 = vst.msk [vmem:[%s931_s18 + $0xd0] sm:$0xff] %vm449_vm6, %v443_v29 }
 0x193   : > { %v413_v30 = vpop.trf.xlu2 }
 0x194   : > { %462 = vst.msk [vmem:[%s931_s18 + $0x60] sm:$0xff] %vm449_vm6, %v413_v30 }
 0x196   : > { %v444_v31 = vpop.trf.xlu0 }
 0x197   : > { %477 = vst.msk [vmem:[%s931_s18 + $0xd8] sm:$0xff] %vm449_vm6, %v444_v31 }
 0x19b   : > { %v414_v32 = vpop.trf.xlu2 }
 0x19c   : > { %463 = vst.msk [vmem:[%s931_s18 + $0x68] sm:$0xff] %vm449_vm6, %v414_v32 }
 0x19e   : > { %v445_v33 = vpop.trf.xlu0 }
 0x19f   : > { %478 = vst.msk [vmem:[%s931_s18 + $0xe0] sm:$0xff] %vm449_vm6, %v445_v33 }
 0x1a3   : > { %v415_v34 = vpop.trf.xlu2 }
 0x1a4   : > { %464 = vst.msk [vmem:[%s931_s18 + $0x70] sm:$0xff] %vm449_vm6, %v415_v34 }
 0x1a6   : > { %v446_v35 = vpop.trf.xlu0 }
 0x1a7   : > { %479 = vst.msk [vmem:[%s931_s18 + $0xe8] sm:$0xff] %vm449_vm6, %v446_v35 }
 0x1ab   : > { %v416_v36 = vpop.trf.xlu2 }
 0x1ac   : > { %465 = vst.msk [vmem:[%s931_s18 + $0x78] sm:$0xff] %vm449_vm6, %v416_v36 }
 0x1ae   : > { %v447_v37 = vpop.trf.xlu0 }
 0x1af   : > { %480 = vst.msk [vmem:[%s931_s18 + $0xf0] sm:$0xff] %vm449_vm6, %v447_v37 }
 0x1b6   : > { %v448_v38 = vpop.trf.xlu0 }
 0x1b7   : > { %481 = vst.msk [vmem:[%s931_s18 + $0xf8] sm:$0xff] %vm449_vm6, %v448_v38 }
 0x1b8 PF: > { %s16_s17 = sadd.s32 1, %s738_s17   ;;  %s1021_s12 = smov %s722_s13 }
 0x1b9   : > { %p13_p0 = scmp.ge.s32.totalorder %s16_s17, 4   ;;  %s1022_s13 = smov %s726_s14 }
 0x1ba   : > { %s1023_s14 = smov %s812_s24  ;;  %s1024_s15 = smov %s734_s16 }
 0x1bb   : > { %s1025_s16 = smov %s1027_s19  ;;  %15 = sbr.rel (!%p13_p0) target bundleno = 4 (0x4), region = 72 }
 0x1c0   :  { %512 = vsyncpa [#allocation3], 1 }
 0x1c1   :  { %514 = vsyncpa [#allocation3 + $0x1], 1 }

</bundles_post_ra>
